<compile_context>
chip_gen: v5e
topology: v5e:2x2
jax: 0.10.0
libtpu: 0.0.40
codegen_flags: <defaults>
</compile_context>

<pallas_src>
import functools

import jax
import jax.numpy as jnp
from jax.experimental import pallas as pl
from jax.experimental.pallas import tpu as pltpu


def _layer_se_kernel(params_ref, x_ref, o_ref, *, num_layers, seg_len,
                     scale_in_io_dtype):
    """One grid step processes a (gb, num_layers * seg_len) slab of batches.

    params_ref: SMEM (N*N + N,) f32 = [W^T / D (row-major) | bias]
    x_ref/o_ref: VMEM (gb, N * seg_len) blocks in the caller's dtype.
    """
    n = num_layers
    d = seg_len

    # Squeeze: per-layer sums over each length-d lane segment (f32 accumulate).
    # 1/D is already folded into the weights, so no per-step divide is needed.
    sums = []
    for i in range(n):
        xi = x_ref[:, i * d:(i + 1) * d]
        sums.append(jnp.sum(xi.astype(jnp.float32), axis=1, keepdims=True))  # (gb, 1)

    # Tiny NxN linear + ReLU + sigmoid on the VPU/EUP, then excite (rescale).
    for j in range(n):
        z = params_ref[n * n + j]                        # bias[j] (SMEM scalar)
        for i in range(n):
            z = z + sums[i] * params_ref[i * n + j]      # (W^T / D)[i, j]
        s = jax.nn.sigmoid(jnp.maximum(z, 0.0))          # (gb, 1) f32
        if scale_in_io_dtype:
            # bf16 path: cast the scale once, multiply in the I/O dtype
            # (halves vreg traffic on the store path; sums stayed f32).
            o_ref[:, j * d:(j + 1) * d] = (
                x_ref[:, j * d:(j + 1) * d] * s.astype(o_ref.dtype))
        else:
            xj = x_ref[:, j * d:(j + 1) * d].astype(jnp.float32)
            o_ref[:, j * d:(j + 1) * d] = (xj * s).astype(o_ref.dtype)


def _vmem_capacity_bytes():
    """Physical VMEM per TensorCore; conservative (v7x-sized) fallback."""
    try:
        return int(pltpu.get_tpu_info().vmem_capacity_bytes)
    except Exception:
        return 64 * 1024 * 1024


def _pick_batches_per_block(batch, row_bytes, cap_bytes, min_steps):
    """Rows per grid step: a multiple of 8 (sublane-dense, (8,128)-legal) that
    fits the per-block byte cap; it does NOT have to divide `batch` (the grid
    uses pl.cdiv and the ragged last block gets masked writeback)."""
    if batch <= 8:
        return batch                       # gb == full batch dim is legal.
    # Largest 8-multiple under the cap (never below one 8-row sublane tile).
    # TODO(synk): add a two-pass (sum then scale), D-tiled fallback for C*H*W
    # so large that even an 8-row block exceeds the VMEM budget.
    cap_rows = max(8, (cap_bytes // max(row_bytes, 1)) // 8 * 8)
    gb = min(cap_rows, pl.cdiv(batch, 8) * 8)
    # Guarantee at least `min_steps` grid steps so the pipeline has something
    # to overlap and (on v7x) both TensorCores get a share of the batch.
    if pl.cdiv(batch, gb) < min_steps:
        gb = max(8, pl.cdiv(pl.cdiv(batch, min_steps), 8) * 8)
    return gb


def layer_se(x, weight, bias, *, donate_x=False):
    """x: (B, N, C, H, W); weight: (N, N); bias: (N,). Returns same shape/dtype."""
    B, N, C, H, W = x.shape
    D = C * H * W

    # Guarantee lane-aligned segment boundaries: pad each layer segment up to a
    # multiple of 128 lanes (zeros do not change the sums; 1/D uses true D).
    d_pad = pl.cdiv(D, 128) * 128
    if d_pad != D:
        x2 = jnp.pad(x.reshape(B, N, D), ((0, 0), (0, 0), (0, d_pad - D)))
        x2 = x2.reshape(B, N * d_pad)
    else:
        x2 = x.reshape(B, N * D)
    L = N * d_pad

    # Fold the 1/D of the mean into W^T and pack [W^T/D | bias] into one small
    # SMEM-resident parameter vector: params[i*N + j] = W[j, i] / D,
    # params[N*N + j] = bias[j].
    wtd = (jnp.transpose(weight).astype(jnp.float32) / jnp.float32(D)).reshape(-1)
    params = jnp.concatenate([wtd, bias.astype(jnp.float32).reshape(-1)])

    # Per-generation block / VMEM budget.
    vmem_cap = _vmem_capacity_bytes()
    if vmem_cap >= 96 * 1024 * 1024:          # v5e / v6e: 128 MiB physical VMEM
        block_cap = 10 * 1024 * 1024
        base_vmem_limit = 64 * 1024 * 1024
        min_steps = 2
    else:                                     # v7x: 64 MiB per TC, 2 TCs/chip
        block_cap = 5 * 1024 * 1024
        base_vmem_limit = 40 * 1024 * 1024
        min_steps = 4

    itemsize = jnp.dtype(x2.dtype).itemsize
    gb = _pick_batches_per_block(B, L * itemsize, block_cap, min_steps)
    grid = (pl.cdiv(B, gb),)

    block_bytes = gb * L * itemsize
    # in + out, each double-buffered, plus headroom; never ask past physical.
    vmem_limit = int(min(max(base_vmem_limit, 4 * block_bytes + (2 << 20)),
                         vmem_cap))

    scale_in_io_dtype = (x2.dtype == jnp.bfloat16)
    kernel = functools.partial(_layer_se_kernel, num_layers=N, seg_len=d_pad,
                               scale_in_io_dtype=scale_in_io_dtype)

    out2 = pl.pallas_call(
        kernel,
        out_shape=jax.ShapeDtypeStruct((B, L), x2.dtype),
        grid=grid,
        in_specs=[
            pl.BlockSpec(memory_space=pltpu.MemorySpace.SMEM),   # params (resident)
            pl.BlockSpec((gb, L), lambda i: (i, 0)),             # x batch-block
        ],
        out_specs=pl.BlockSpec((gb, L), lambda i: (i, 0)),
        input_output_aliases={1: 0} if donate_x else {},
        compiler_params=pltpu.CompilerParams(
            dimension_semantics=("parallel",),
            vmem_limit_bytes=vmem_limit,
        ),
    )(params, x2)

    if d_pad != D:
        out2 = out2.reshape(B, N, d_pad)[:, :, :D]
    return out2.reshape(B, N, C, H, W)


def _reference(x, weight, bias):
    m = x.reshape(x.shape[0], x.shape[1], -1).mean(axis=2)
    s = jax.nn.sigmoid(jnp.maximum(m @ weight.T + bias, 0.0))
    return s[:, :, None, None, None] * x


if __name__ == "__main__":
    # Small shapes consistent with the module: N must be 4 (fc1: Linear(4, 4)).
    B, N, C, H, W = 2, 4, 4, 16, 16

    key = jax.random.PRNGKey(0)
    kx, kw, kb = jax.random.split(key, 3)
    x = jax.random.normal(kx, (B, N, C, H, W), dtype=jnp.float32)

    # Deterministic synthetic fc1 parameters (shapes from nn.Linear(4, 4)).
    fc1_weight = jax.random.uniform(kw, (N, N), dtype=jnp.float32,
                                    minval=-0.5, maxval=0.5)
    fc1_bias = jax.random.uniform(kb, (N,), dtype=jnp.float32,
                                  minval=-0.5, maxval=0.5)

    # f32 path, B == 2 (single block).
    out = jax.block_until_ready(layer_se(x, fc1_weight, fc1_bias))
    ref = _reference(x, fc1_weight, fc1_bias)
    assert out.shape == (B, N, C, H, W)
    assert out.dtype == x.dtype
    assert jnp.allclose(out, ref, atol=1e-5, rtol=1e-5)

    # bf16 path with a ragged batch (B=10, gb=8 -> 2 grid steps, masked last
    # block) exercising the new cdiv grid + bf16 excite multiply.
    B2 = 10
    xb = jax.random.normal(jax.random.PRNGKey(1), (B2, N, C, H, W),
                           dtype=jnp.float32).astype(jnp.bfloat16)
    out_b = jax.block_until_ready(layer_se(xb, fc1_weight, fc1_bias))
    ref_b = _reference(xb.astype(jnp.float32), fc1_weight, fc1_bias)
    assert out_b.shape == xb.shape
    assert out_b.dtype == jnp.bfloat16
    assert jnp.allclose(out_b.astype(jnp.float32), ref_b, atol=3e-2, rtol=3e-2)

    print("KERNEL_OK")
</pallas_src>

<mosaic_0001>
module attributes {stable_mosaic.version = 11 : i64} {
  func.func @_layer_se_kernel(%arg0: i32, %arg1: memref<20xf32, #tpu.memory_space<smem>>, %arg2: memref<2x4096xf32, #tpu.memory_space<vmem>>, %arg3: memref<2x4096xf32, #tpu.memory_space<vmem>>) attributes {dimension_semantics = [#tpu.dimension_semantics<parallel>], iteration_bounds = array<i64: 1>, scalar_prefetch = 0 : i64, scratch_operands = 0 : i64, tpu.core_type = #tpu.core_type<tc>, window_params = [{transform_indices = @transform_0, window_bounds = array<i64: 20>}, {transform_indices = @transform_1, window_bounds = array<i64: 2, 4096>}, {transform_indices = @transform_2, window_bounds = array<i64: 2, 4096>}]} {
    %c0 = arith.constant 0 : index
    %c0_0 = arith.constant 0 : index
    %0 = vector.load %arg2[%c0, %c0_0] : memref<2x4096xf32, #tpu.memory_space<vmem>>, vector<2x1024xf32>
    %cst = arith.constant dense<0.000000e+00> : vector<2xf32>
    %1 = vector.multi_reduction <add>, %0, %cst [1] : vector<2x1024xf32> to vector<2xf32>
    %2 = vector.shape_cast %1 : vector<2xf32> to vector<2x1xf32>
    %c0_1 = arith.constant 0 : index
    %c1024 = arith.constant 1024 : index
    %3 = vector.load %arg2[%c0_1, %c1024] : memref<2x4096xf32, #tpu.memory_space<vmem>>, vector<2x1024xf32>
    %cst_2 = arith.constant dense<0.000000e+00> : vector<2xf32>
    %4 = vector.multi_reduction <add>, %3, %cst_2 [1] : vector<2x1024xf32> to vector<2xf32>
    %5 = vector.shape_cast %4 : vector<2xf32> to vector<2x1xf32>
    %c0_3 = arith.constant 0 : index
    %c2048 = arith.constant 2048 : index
    %6 = vector.load %arg2[%c0_3, %c2048] : memref<2x4096xf32, #tpu.memory_space<vmem>>, vector<2x1024xf32>
    %cst_4 = arith.constant dense<0.000000e+00> : vector<2xf32>
    %7 = vector.multi_reduction <add>, %6, %cst_4 [1] : vector<2x1024xf32> to vector<2xf32>
    %8 = vector.shape_cast %7 : vector<2xf32> to vector<2x1xf32>
    %c0_5 = arith.constant 0 : index
    %c3072 = arith.constant 3072 : index
    %9 = vector.load %arg2[%c0_5, %c3072] : memref<2x4096xf32, #tpu.memory_space<vmem>>, vector<2x1024xf32>
    %cst_6 = arith.constant dense<0.000000e+00> : vector<2xf32>
    %10 = vector.multi_reduction <add>, %9, %cst_6 [1] : vector<2x1024xf32> to vector<2xf32>
    %11 = vector.shape_cast %10 : vector<2xf32> to vector<2x1xf32>
    %c16 = arith.constant 16 : index
    %12 = memref.load %arg1[%c16] : memref<20xf32, #tpu.memory_space<smem>>
    %c0_7 = arith.constant 0 : index
    %13 = memref.load %arg1[%c0_7] : memref<20xf32, #tpu.memory_space<smem>>
    %14 = vector.broadcast %13 : f32 to vector<2x1xf32>
    %15 = arith.mulf %2, %14 : vector<2x1xf32>
    %16 = vector.broadcast %12 : f32 to vector<2x1xf32>
    %17 = arith.addf %16, %15 : vector<2x1xf32>
    %c4 = arith.constant 4 : index
    %18 = memref.load %arg1[%c4] : memref<20xf32, #tpu.memory_space<smem>>
    %19 = vector.broadcast %18 : f32 to vector<2x1xf32>
    %20 = arith.mulf %5, %19 : vector<2x1xf32>
    %21 = arith.addf %17, %20 : vector<2x1xf32>
    %c8 = arith.constant 8 : index
    %22 = memref.load %arg1[%c8] : memref<20xf32, #tpu.memory_space<smem>>
    %23 = vector.broadcast %22 : f32 to vector<2x1xf32>
    %24 = arith.mulf %8, %23 : vector<2x1xf32>
    %25 = arith.addf %21, %24 : vector<2x1xf32>
    %c12 = arith.constant 12 : index
    %26 = memref.load %arg1[%c12] : memref<20xf32, #tpu.memory_space<smem>>
    %27 = vector.broadcast %26 : f32 to vector<2x1xf32>
    %28 = arith.mulf %11, %27 : vector<2x1xf32>
    %29 = arith.addf %25, %28 : vector<2x1xf32>
    %cst_8 = arith.constant 0.000000e+00 : f32
    %30 = vector.broadcast %cst_8 : f32 to vector<2x1xf32>
    %31 = arith.maximumf %29, %30 : vector<2x1xf32>
    %32 = arith.negf %31 : vector<2x1xf32>
    %33 = math.exp %32 : vector<2x1xf32>
    %cst_9 = arith.constant 1.000000e+00 : f32
    %34 = vector.broadcast %cst_9 : f32 to vector<2x1xf32>
    %35 = arith.addf %34, %33 : vector<2x1xf32>
    %36 = arith.divf %34, %35 : vector<2x1xf32>
    %c0_10 = arith.constant 0 : index
    %c0_11 = arith.constant 0 : index
    %37 = vector.load %arg2[%c0_10, %c0_11] : memref<2x4096xf32, #tpu.memory_space<vmem>>, vector<2x1024xf32>
    %38 = vector.broadcast %36 : vector<2x1xf32> to vector<2x1024xf32>
    %39 = arith.mulf %37, %38 : vector<2x1024xf32>
    %c0_12 = arith.constant 0 : index
    %c0_13 = arith.constant 0 : index
    %40 = vector.load %arg3[%c0_12, %c0_13] : memref<2x4096xf32, #tpu.memory_space<vmem>>, vector<2x1024xf32>
    tpu.vector_store %arg3[%c0_12, %c0_13], %39 {strides = array<i32>} : memref<2x4096xf32, #tpu.memory_space<vmem>>, vector<2x1024xf32>,
    %c17 = arith.constant 17 : index
    %41 = memref.load %arg1[%c17] : memref<20xf32, #tpu.memory_space<smem>>
    %c1 = arith.constant 1 : index
    %42 = memref.load %arg1[%c1] : memref<20xf32, #tpu.memory_space<smem>>
    %43 = vector.broadcast %42 : f32 to vector<2x1xf32>
    %44 = arith.mulf %2, %43 : vector<2x1xf32>
    %45 = vector.broadcast %41 : f32 to vector<2x1xf32>
    %46 = arith.addf %45, %44 : vector<2x1xf32>
    %c5 = arith.constant 5 : index
    %47 = memref.load %arg1[%c5] : memref<20xf32, #tpu.memory_space<smem>>
    %48 = vector.broadcast %47 : f32 to vector<2x1xf32>
    %49 = arith.mulf %5, %48 : vector<2x1xf32>
    %50 = arith.addf %46, %49 : vector<2x1xf32>
    %c9 = arith.constant 9 : index
    %51 = memref.load %arg1[%c9] : memref<20xf32, #tpu.memory_space<smem>>
    %52 = vector.broadcast %51 : f32 to vector<2x1xf32>
    %53 = arith.mulf %8, %52 : vector<2x1xf32>
    %54 = arith.addf %50, %53 : vector<2x1xf32>
    %c13 = arith.constant 13 : index
    %55 = memref.load %arg1[%c13] : memref<20xf32, #tpu.memory_space<smem>>
    %56 = vector.broadcast %55 : f32 to vector<2x1xf32>
    %57 = arith.mulf %11, %56 : vector<2x1xf32>
    %58 = arith.addf %54, %57 : vector<2x1xf32>
    %cst_14 = arith.constant 0.000000e+00 : f32
    %59 = vector.broadcast %cst_14 : f32 to vector<2x1xf32>
    %60 = arith.maximumf %58, %59 : vector<2x1xf32>
    %61 = arith.negf %60 : vector<2x1xf32>
    %62 = math.exp %61 : vector<2x1xf32>
    %cst_15 = arith.constant 1.000000e+00 : f32
    %63 = vector.broadcast %cst_15 : f32 to vector<2x1xf32>
    %64 = arith.addf %63, %62 : vector<2x1xf32>
    %65 = arith.divf %63, %64 : vector<2x1xf32>
    %c0_16 = arith.constant 0 : index
    %c1024_17 = arith.constant 1024 : index
    %66 = vector.load %arg2[%c0_16, %c1024_17] : memref<2x4096xf32, #tpu.memory_space<vmem>>, vector<2x1024xf32>
    %67 = vector.broadcast %65 : vector<2x1xf32> to vector<2x1024xf32>
    %68 = arith.mulf %66, %67 : vector<2x1024xf32>
    %c0_18 = arith.constant 0 : index
    %c1024_19 = arith.constant 1024 : index
    %69 = vector.load %arg3[%c0_18, %c1024_19] : memref<2x4096xf32, #tpu.memory_space<vmem>>, vector<2x1024xf32>
    tpu.vector_store %arg3[%c0_18, %c1024_19], %68 {strides = array<i32>} : memref<2x4096xf32, #tpu.memory_space<vmem>>, vector<2x1024xf32>,
    %c18 = arith.constant 18 : index
    %70 = memref.load %arg1[%c18] : memref<20xf32, #tpu.memory_space<smem>>
    %c2 = arith.constant 2 : index
    %71 = memref.load %arg1[%c2] : memref<20xf32, #tpu.memory_space<smem>>
    %72 = vector.broadcast %71 : f32 to vector<2x1xf32>
    %73 = arith.mulf %2, %72 : vector<2x1xf32>
    %74 = vector.broadcast %70 : f32 to vector<2x1xf32>
    %75 = arith.addf %74, %73 : vector<2x1xf32>
    %c6 = arith.constant 6 : index
    %76 = memref.load %arg1[%c6] : memref<20xf32, #tpu.memory_space<smem>>
    %77 = vector.broadcast %76 : f32 to vector<2x1xf32>
    %78 = arith.mulf %5, %77 : vector<2x1xf32>
    %79 = arith.addf %75, %78 : vector<2x1xf32>
    %c10 = arith.constant 10 : index
    %80 = memref.load %arg1[%c10] : memref<20xf32, #tpu.memory_space<smem>>
    %81 = vector.broadcast %80 : f32 to vector<2x1xf32>
    %82 = arith.mulf %8, %81 : vector<2x1xf32>
    %83 = arith.addf %79, %82 : vector<2x1xf32>
    %c14 = arith.constant 14 : index
    %84 = memref.load %arg1[%c14] : memref<20xf32, #tpu.memory_space<smem>>
    %85 = vector.broadcast %84 : f32 to vector<2x1xf32>
    %86 = arith.mulf %11, %85 : vector<2x1xf32>
    %87 = arith.addf %83, %86 : vector<2x1xf32>
    %cst_20 = arith.constant 0.000000e+00 : f32
    %88 = vector.broadcast %cst_20 : f32 to vector<2x1xf32>
    %89 = arith.maximumf %87, %88 : vector<2x1xf32>
    %90 = arith.negf %89 : vector<2x1xf32>
    %91 = math.exp %90 : vector<2x1xf32>
    %cst_21 = arith.constant 1.000000e+00 : f32
    %92 = vector.broadcast %cst_21 : f32 to vector<2x1xf32>
    %93 = arith.addf %92, %91 : vector<2x1xf32>
    %94 = arith.divf %92, %93 : vector<2x1xf32>
    %c0_22 = arith.constant 0 : index
    %c2048_23 = arith.constant 2048 : index
    %95 = vector.load %arg2[%c0_22, %c2048_23] : memref<2x4096xf32, #tpu.memory_space<vmem>>, vector<2x1024xf32>
    %96 = vector.broadcast %94 : vector<2x1xf32> to vector<2x1024xf32>
    %97 = arith.mulf %95, %96 : vector<2x1024xf32>
    %c0_24 = arith.constant 0 : index
    %c2048_25 = arith.constant 2048 : index
    %98 = vector.load %arg3[%c0_24, %c2048_25] : memref<2x4096xf32, #tpu.memory_space<vmem>>, vector<2x1024xf32>
    tpu.vector_store %arg3[%c0_24, %c2048_25], %97 {strides = array<i32>} : memref<2x4096xf32, #tpu.memory_space<vmem>>, vector<2x1024xf32>,
    %c19 = arith.constant 19 : index
    %99 = memref.load %arg1[%c19] : memref<20xf32, #tpu.memory_space<smem>>
    %c3 = arith.constant 3 : index
    %100 = memref.load %arg1[%c3] : memref<20xf32, #tpu.memory_space<smem>>
    %101 = vector.broadcast %100 : f32 to vector<2x1xf32>
    %102 = arith.mulf %2, %101 : vector<2x1xf32>
    %103 = vector.broadcast %99 : f32 to vector<2x1xf32>
    %104 = arith.addf %103, %102 : vector<2x1xf32>
    %c7 = arith.constant 7 : index
    %105 = memref.load %arg1[%c7] : memref<20xf32, #tpu.memory_space<smem>>
    %106 = vector.broadcast %105 : f32 to vector<2x1xf32>
    %107 = arith.mulf %5, %106 : vector<2x1xf32>
    %108 = arith.addf %104, %107 : vector<2x1xf32>
    %c11 = arith.constant 11 : index
    %109 = memref.load %arg1[%c11] : memref<20xf32, #tpu.memory_space<smem>>
    %110 = vector.broadcast %109 : f32 to vector<2x1xf32>
    %111 = arith.mulf %8, %110 : vector<2x1xf32>
    %112 = arith.addf %108, %111 : vector<2x1xf32>
    %c15 = arith.constant 15 : index
    %113 = memref.load %arg1[%c15] : memref<20xf32, #tpu.memory_space<smem>>
    %114 = vector.broadcast %113 : f32 to vector<2x1xf32>
    %115 = arith.mulf %11, %114 : vector<2x1xf32>
    %116 = arith.addf %112, %115 : vector<2x1xf32>
    %cst_26 = arith.constant 0.000000e+00 : f32
    %117 = vector.broadcast %cst_26 : f32 to vector<2x1xf32>
    %118 = arith.maximumf %116, %117 : vector<2x1xf32>
    %119 = arith.negf %118 : vector<2x1xf32>
    %120 = math.exp %119 : vector<2x1xf32>
    %cst_27 = arith.constant 1.000000e+00 : f32
    %121 = vector.broadcast %cst_27 : f32 to vector<2x1xf32>
    %122 = arith.addf %121, %120 : vector<2x1xf32>
    %123 = arith.divf %121, %122 : vector<2x1xf32>
    %c0_28 = arith.constant 0 : index
    %c3072_29 = arith.constant 3072 : index
    %124 = vector.load %arg2[%c0_28, %c3072_29] : memref<2x4096xf32, #tpu.memory_space<vmem>>, vector<2x1024xf32>
    %125 = vector.broadcast %123 : vector<2x1xf32> to vector<2x1024xf32>
    %126 = arith.mulf %124, %125 : vector<2x1024xf32>
    %c0_30 = arith.constant 0 : index
    %c3072_31 = arith.constant 3072 : index
    %127 = vector.load %arg3[%c0_30, %c3072_31] : memref<2x4096xf32, #tpu.memory_space<vmem>>, vector<2x1024xf32>
    tpu.vector_store %arg3[%c0_30, %c3072_31], %126 {strides = array<i32>} : memref<2x4096xf32, #tpu.memory_space<vmem>>, vector<2x1024xf32>,
    return
  }
  func.func @transform_0(%arg0: i32) -> i32 {
    %c0_i32 = arith.constant 0 : i32
    %c0_i32_0 = arith.constant 0 : i32
    return %c0_i32 : i32
  }
  func.func @transform_1(%arg0: i32) -> (i32, i32) {
    %c0_i32 = arith.constant 0 : i32
    %c0_i32_0 = arith.constant 0 : i32
    return %arg0, %c0_i32 : i32, i32
  }
  func.func @transform_2(%arg0: i32) -> (i32, i32) {
    %c0_i32 = arith.constant 0 : i32
    %c0_i32_0 = arith.constant 0 : i32
    return %arg0, %c0_i32 : i32, i32
  }
}

</mosaic_0001>

<bundles_post_ra>
// kernel: tpu_custom_call.1
= control target key start
LH: loop header
LB: loop body
LE: loop exit
PB: predicated region body
PF: predicated region fallthrough
CT: control target
= control target key end

     0   :  { %7 = vsyncpa [#allocation5], 0  ;;  %s675_s0 = inlined_call_operand.hbm [shape: f32[20], index: 0, kind: input, shape index: {}]   ;;  %s676_s1 = inlined_call_operand.hbm [shape: f32[2,4096], index: 1, kind: input, shape index: {}]   ;;  %s677_s2 = inlined_call_operand.hbm [shape: f32[2,4096], index: 2, kind: output, shape index: {}]  }
   0x1   :  { %8 = vsyncpa [#allocation3], 0 }
   0x2   :  { %9 = vsyncpa [#allocation4], 0  ;;  %s15_s11 = sshll.u32 %s675_s0, 4  ;;  %s24_s14 = sshll.u32 %s676_s1, 4  ;;  %s16_s11 = int_to_ptr.hbm [resolvable:$true] %s15_s11  ;;  %s25_s14 = int_to_ptr.hbm [resolvable:$true] %s24_s14 }
   0x3   :  { %s525_s15 = smov [#allocation2]   ;;  %s526_s16 = smov [#allocation6]  }
   0x4   :  { %18 = dma.hbm_to_smem %s16_s11, 16, %s525_s15, [#allocation5]  }
   0x5   :  { %s26_s17 = sshll.u32 %s526_s16, 4  ;;  %s27_s17 = int_to_ptr.vmem [resolvable:$true] %s26_s17 }
   0x6   :  { %29 = dma.hbm_to_vmem [thread:$0]  %s25_s14, 1024, %s27_s17, [#allocation3]  }
   0x7   :  { %519 = dma.done.wait [#allocation5], 16  }
   0x8   :  { %520 = vsyncadd [#allocation5], 4294967280 }
   0x9   :  { %521 = dma.done.wait [#allocation3], 1024  }
   0xa   :  { %522 = vsyncadd [#allocation3], 4294966272 }
   0xb   :  { %38 = sfence }
   0xc   :  { %v550_v0 = vld [vmem:[#allocation6] sm:$0xff]  ;;  %v552_v1 = vld [vmem:[#allocation6 + $0x8] sm:$0xff]  ;;  %vm62_vm0 = vcmask 1041408   ;;  %v556_v2 = vld [vmem:[#allocation6 + $0x10] sm:$0xff]  ;;  %s201_s0 = sld [smem:[#allocation2]]  ;;  %s528_s8 = smov [#allocation7]  }
   0xd   :  { %43 = vst [vmem:[#allocation1] ss:$4 sm:$0xff] %v550_v0  ;;  %v558_v5 = vld [vmem:[#allocation6 + $0x18] sm:$0xff]  ;;  %v570_v23 = vld [vmem:[#allocation6 + $0x20] sm:$0xff]  ;;  %v572_v27 = vld [vmem:[#allocation6 + $0x28] sm:$0xff]  ;;  %s422_s1 = sld [smem:[#allocation2 + $0x1]] }
   0xe   :  { %45 = vst [vmem:[#allocation1 + $0x20] ss:$4 sm:$0xff] %v552_v1  ;;  %v584_v48 = vld [vmem:[#allocation6 + $0x30] sm:$0xff]  ;;  %v586_v52 = vld [vmem:[#allocation6 + $0x38] sm:$0xff]  ;;  %s428_s18 = sld [smem:[#allocation2 + $0x2]]  ;;  %s403_s9 = sshll.u32 %s528_s8, 4  ;;  %s404_s9 = int_to_ptr.vmem [resolvable:$true] %s403_s9 }
   0xf   :  { %s434_s19 = sld [smem:[#allocation2 + $0x3]]  ;;  %s405_s12 = sshll.u32 %s677_s2, 4  ;;  %s406_s12 = int_to_ptr.hbm [resolvable:$true] %s405_s12 }
  0x10   :  { %s606_s20 = sld [smem:[#allocation2 + $0x10]] }
  0x11   :  { %s608_s21 = sld [smem:[#allocation2 + $0x4]] }
  0x12   :  { %s610_s22 = sld [smem:[#allocation2 + $0x11]] }
  0x13   :  { %s612_s23 = sld [smem:[#allocation2 + $0x5]] }
  0x14   :  { %v46_v3 = vld.sshfl [vmem:[#allocation1] sm:$0xff pattern:$0x73625140]  ;;  %v47_v4 = vld.sshfl [vmem:[#allocation1 + $0x8] sm:$0xff pattern:$0x73625140] }
  0x15   :  { %v48_v6 = vld.sshfl [vmem:[#allocation1 + $0x10] sm:$0xff pattern:$0x73625140]  ;;  %v49_v7 = vld.sshfl [vmem:[#allocation1 + $0x18] sm:$0xff pattern:$0x73625140] }
  0x16   :  { %v50_v8 = vld.sshfl [vmem:[#allocation1 + $0x20] sm:$0xff pattern:$0x73625140]  ;;  %v51_v9 = vld.sshfl [vmem:[#allocation1 + $0x28] sm:$0xff pattern:$0x73625140] }
  0x17   :  { %v52_v10 = vld.sshfl [vmem:[#allocation1 + $0x30] sm:$0xff pattern:$0x73625140]  ;;  %v53_v11 = vld.sshfl [vmem:[#allocation1 + $0x38] sm:$0xff pattern:$0x73625140] }
  0x18   :  { %v63_v12 = vsel %vm62_vm0, %v46_v3, 0.0  ;;  %v64_v13 = vsel %vm62_vm0, %v47_v4, 0.0  ;;  %v66_v14 = vsel %vm62_vm0, %v48_v6, 0.0  ;;  %84 = vst [vmem:[#allocation1] ss:$4 sm:$0xff] %v556_v2  ;;  %v68_v16 = vsel %vm62_vm0, %v49_v7, 0.0 }
  0x19   :  { %v65_v15 = vadd.f32 %v64_v13, %v63_v12  ;;  %86 = vst [vmem:[#allocation1 + $0x20] ss:$4 sm:$0xff] %v558_v5  ;;  %v70_v18 = vsel %vm62_vm0, %v50_v8, 0.0  ;;  %v72_v20 = vsel %vm62_vm0, %v51_v9, 0.0  ;;  %v74_v21 = vsel %vm62_vm0, %v52_v10, 0.0  ;;  %s614_s24 = sld [smem:[#allocation2 + $0x12]] }
  0x1a   :  { %v76_v22 = vsel %vm62_vm0, %v53_v11, 0.0  ;;  %s616_s25 = sld [smem:[#allocation2 + $0x6]] }
  0x1b   :  { %v67_v17 = vadd.f32 %v66_v14, %v65_v15  ;;  %s433_s26 = sld [smem:[#allocation2 + $0x13]] }
  0x1c   :  { %s618_s27 = sld [smem:[#allocation2 + $0x7]] }
  0x1d   :  { %v69_v19 = vadd.f32 %v68_v16, %v67_v17  ;;  %s620_s28 = sld [smem:[#allocation2 + $0x8]] }
  0x1e   :  { %s622_s29 = sld [smem:[#allocation2 + $0x9]] }
  0x1f   :  { %v71_v24 = vadd.f32 %v70_v18, %v69_v19  ;;  %v87_v25 = vld.sshfl [vmem:[#allocation1] sm:$0xff pattern:$0x73625140]  ;;  %v88_v26 = vld.sshfl [vmem:[#allocation1 + $0x8] sm:$0xff pattern:$0x73625140] }
  0x20   :  { %v89_v28 = vld.sshfl [vmem:[#allocation1 + $0x10] sm:$0xff pattern:$0x73625140]  ;;  %v90_v29 = vld.sshfl [vmem:[#allocation1 + $0x18] sm:$0xff pattern:$0x73625140] }
  0x21   :  { %v73_v30 = vadd.f32 %v72_v20, %v71_v24  ;;  %v91_v31 = vld.sshfl [vmem:[#allocation1 + $0x20] sm:$0xff pattern:$0x73625140]  ;;  %v92_v32 = vld.sshfl [vmem:[#allocation1 + $0x28] sm:$0xff pattern:$0x73625140] }
  0x22   :  { %v93_v33 = vld.sshfl [vmem:[#allocation1 + $0x30] sm:$0xff pattern:$0x73625140]  ;;  %v94_v34 = vld.sshfl [vmem:[#allocation1 + $0x38] sm:$0xff pattern:$0x73625140] }
  0x23   :  { %v75_v35 = vadd.f32 %v74_v21, %v73_v30  ;;  %v103_v36 = vsel %vm62_vm0, %v87_v25, 0.0  ;;  %v104_v37 = vsel %vm62_vm0, %v88_v26, 0.0  ;;  %v106_v38 = vsel %vm62_vm0, %v89_v28, 0.0  ;;  %124 = vst [vmem:[#allocation1] ss:$4 sm:$0xff] %v570_v23  ;;  %s624_s30 = sld [smem:[#allocation2 + $0xa]] }
  0x24   :  { %v105_v39 = vadd.f32 %v104_v37, %v103_v36  ;;  %126 = vst [vmem:[#allocation1 + $0x20] ss:$4 sm:$0xff] %v572_v27  ;;  %v108_v41 = vsel %vm62_vm0, %v90_v29, 0.0  ;;  %v110_v43 = vsel %vm62_vm0, %v91_v31, 0.0  ;;  %v112_v45 = vsel %vm62_vm0, %v92_v32, 0.0  ;;  %s626_s3 = sld [smem:[#allocation2 + $0xb]] }
  0x25   :  { %v77_v40 = vadd.f32 %v76_v22, %v75_v35  ;;  %v114_v46 = vsel %vm62_vm0, %v93_v33, 0.0  ;;  %v116_v47 = vsel %vm62_vm0, %v94_v34, 0.0  ;;  %s631_s4 = sld [smem:[#allocation2 + $0xc]] }
  0x26   :  { %v107_v42 = vadd.f32 %v106_v38, %v105_v39  ;;  %s637_s5 = sld [smem:[#allocation2 + $0xd]] }
  0x27   :  { %78 = vadd.xlane.f32.xlu0 %v77_v40  ;;  %s639_s6 = sld [smem:[#allocation2 + $0xe]] }
  0x28   :  { %v109_v44 = vadd.f32 %v108_v41, %v107_v42  ;;  %s437_s7 = sld [smem:[#allocation2 + $0xf]] }
  0x2a   :  { %v111_v49 = vadd.f32 %v110_v43, %v109_v44  ;;  %v127_v50 = vld.sshfl [vmem:[#allocation1] sm:$0xff pattern:$0x73625140]  ;;  %v128_v51 = vld.sshfl [vmem:[#allocation1 + $0x8] sm:$0xff pattern:$0x73625140]  ;;  %v202_v43 = vstv %s201_s0  ;;  %v250_v44 = vstv %s422_s1 }
  0x2b   :  { %v129_v53 = vld.sshfl [vmem:[#allocation1 + $0x10] sm:$0xff pattern:$0x73625140]  ;;  %v130_v54 = vld.sshfl [vmem:[#allocation1 + $0x18] sm:$0xff pattern:$0x73625140] }
  0x2c   :  { %v113_v55 = vadd.f32 %v112_v45, %v111_v49  ;;  %v131_v56 = vld.sshfl [vmem:[#allocation1 + $0x20] sm:$0xff pattern:$0x73625140]  ;;  %v132_v57 = vld.sshfl [vmem:[#allocation1 + $0x28] sm:$0xff pattern:$0x73625140]  ;;  %v300_v45 = vstv %s428_s18 }
  0x2d   :  { %v133_v58 = vld.sshfl [vmem:[#allocation1 + $0x30] sm:$0xff pattern:$0x73625140]  ;;  %v134_v59 = vld.sshfl [vmem:[#allocation1 + $0x38] sm:$0xff pattern:$0x73625140] }
  0x2e   :  { %v115_v60 = vadd.f32 %v114_v46, %v113_v55  ;;  %v143_v61 = vsel %vm62_vm0, %v127_v50, 0.0  ;;  %v144_v62 = vsel %vm62_vm0, %v128_v51, 0.0  ;;  %v146_v63 = vsel %vm62_vm0, %v129_v53, 0.0  ;;  %164 = vst [vmem:[#allocation1] ss:$4 sm:$0xff] %v584_v48 }
  0x2f   :  { %v145_v3 = vadd.f32 %v144_v62, %v143_v61  ;;  %166 = vst [vmem:[#allocation1 + $0x20] ss:$4 sm:$0xff] %v586_v52  ;;  %v148_v6 = vsel %vm62_vm0, %v130_v54, 0.0  ;;  %v150_v8 = vsel %vm62_vm0, %v131_v56, 0.0  ;;  %v152_v10 = vsel %vm62_vm0, %v132_v57, 0.0 }
  0x30   :  { %v117_v4 = vadd.f32 %v116_v47, %v115_v60  ;;  %v154_v12 = vsel %vm62_vm0, %v133_v58, 0.0  ;;  %v156_v17 = vsel %vm62_vm0, %v134_v59, 0.0  ;;  %v350_v46 = vstv %s434_s19 }
  0x31   :  { %v147_v7 = vadd.f32 %v146_v63, %v145_v3  ;;  %v204_v53 = vstv %s606_s20  ;;  %v252_v54 = vstv %s610_s22  ;;  %v302_v55 = vstv %s614_s24 }
  0x32   :  { %118 = vadd.xlane.f32.xlu0 %v117_v4  ;;  %v352_v56 = vstv %s433_s26  ;;  %v207_v57 = vstv %s608_s21  ;;  %v255_v58 = vstv %s612_s23  ;;  %v305_v59 = vstv %s616_s25 }
  0x33   :  { %v149_v9 = vadd.f32 %v148_v6, %v147_v7  ;;  %v355_v60 = vstv %s618_s27 }
  0x35   :  { %v151_v11 = vadd.f32 %v150_v8, %v149_v9  ;;  %v167_v13 = vld.sshfl [vmem:[#allocation1] sm:$0xff pattern:$0x73625140]  ;;  %v168_v14 = vld.sshfl [vmem:[#allocation1 + $0x8] sm:$0xff pattern:$0x73625140] }
  0x36   :  { %v169_v15 = vld.sshfl [vmem:[#allocation1 + $0x10] sm:$0xff pattern:$0x73625140]  ;;  %v170_v18 = vld.sshfl [vmem:[#allocation1 + $0x18] sm:$0xff pattern:$0x73625140] }
  0x37   :  { %v153_v16 = vadd.f32 %v152_v10, %v151_v11  ;;  %v183_v20 = vsel %vm62_vm0, %v167_v13, 0.0  ;;  %v184_v21 = vsel %vm62_vm0, %v168_v14, 0.0  ;;  %v186_v22 = vsel %vm62_vm0, %v169_v15, 0.0  ;;  %v171_v24 = vld.sshfl [vmem:[#allocation1 + $0x20] sm:$0xff pattern:$0x73625140] }
  0x38   :  { %v185_v25 = vadd.f32 %v184_v21, %v183_v20  ;;  %v188_v28 = vsel %vm62_vm0, %v170_v18, 0.0  ;;  %v172_v29 = vld.sshfl [vmem:[#allocation1 + $0x28] sm:$0xff pattern:$0x73625140]  ;;  %v190_v31 = vsel %vm62_vm0, %v171_v24, 0.0  ;;  %v211_v11 = vstv %s620_s28 }
  0x39   :  { %v155_v19 = vadd.f32 %v154_v12, %v153_v16  ;;  %v173_v32 = vld.sshfl [vmem:[#allocation1 + $0x30] sm:$0xff pattern:$0x73625140]  ;;  %v192_v34 = vsel %vm62_vm0, %v172_v29, 0.0  ;;  %v259_v12 = vstv %s622_s29  ;;  %v309_v13 = vstv %s624_s30 }
  0x3a   :  { %v187_v30 = vadd.f32 %v186_v22, %v185_v25  ;;  %v174_v35 = vld.sshfl [vmem:[#allocation1 + $0x38] sm:$0xff pattern:$0x73625140]  ;;  %v194_v37 = vsel %vm62_vm0, %v173_v32, 0.0  ;;  %v359_v14 = vstv %s626_s3  ;;  %v215_v24 = vstv %s631_s4 }
  0x3b   :  { %v157_v26 = vadd.f32 %v156_v17, %v155_v19  ;;  %v196_v39 = vsel %vm62_vm0, %v174_v35, 0.0  ;;  %v263_v25 = vstv %s637_s5 }
  0x3c   :  { %v189_v33 = vadd.f32 %v188_v28, %v187_v30  ;;  %v363_v28 = vstv %s437_s7 }
  0x3d   :  { %158 = vadd.xlane.f32.xlu1 %v157_v26  ;;  %v313_v26 = vstv %s639_s6 }
  0x3e   :  { %v191_v36 = vadd.f32 %v190_v31, %v189_v33 }
  0x40   :  { %v193_v38 = vadd.f32 %v192_v34, %v191_v36 }
  0x42   :  { %v195_v40 = vadd.f32 %v194_v37, %v193_v38 }
  0x44   :  { %v197_v41 = vadd.f32 %v196_v39, %v195_v40 }
  0x46   :  { %198 = vadd.xlane.f32.xlu1 %v197_v41 }
  0x9a   :  { %v79_v42 = vpop.xlane.xlu0 %78 }
  0x9b   :  { %v203_v47 = vmul.f32 %v202_v43, %v79_v42  ;;  %v251_v49 = vmul.f32 %v250_v44, %v79_v42  ;;  %v301_v50 = vmul.f32 %v300_v45, %v79_v42  ;;  %v351_v51 = vmul.f32 %v350_v46, %v79_v42 }
  0x9d   :  { %v205_v62 = vadd.f32 %v204_v53, %v203_v47  ;;  %v253_v63 = vadd.f32 %v252_v54, %v251_v49  ;;  %v303_v3 = vadd.f32 %v302_v55, %v301_v50  ;;  %v353_v4 = vadd.f32 %v352_v56, %v351_v51 }
  0xa5   :  { %v119_v61 = vpop.xlane.xlu0 %118 }
  0xa6   :  { %v208_v7 = vmul.f32 %v207_v57, %v119_v61  ;;  %v256_v8 = vmul.f32 %v255_v58, %v119_v61  ;;  %v306_v9 = vmul.f32 %v305_v59, %v119_v61  ;;  %v356_v10 = vmul.f32 %v355_v60, %v119_v61 }
  0xa7   :  { %v527_v60 = vmov 269488144  }
  0xa8   :  { %v209_v15 = vadd.f32 %v208_v7, %v205_v62  ;;  %v257_v16 = vadd.f32 %v256_v8, %v253_v63  ;;  %v307_v17 = vadd.f32 %v306_v9, %v303_v3  ;;  %v357_v18 = vadd.f32 %v356_v10, %v353_v4 }
  0xa9   :  { %v240_v61 = vunpack.c.l.s4 %v527_v60 }
  0xab   :  { %v241_v10 = vunpack.c.0.s8 %v240_v61 }
  0xb0   :  { %v159_v6 = vpop.xlane.xlu1 %158 }
  0xb1   :  { %v212_v19 = vmul.f32 %v211_v11, %v159_v6  ;;  %v260_v20 = vmul.f32 %v259_v12, %v159_v6  ;;  %v310_v21 = vmul.f32 %v309_v13, %v159_v6  ;;  %v360_v22 = vmul.f32 %v359_v14, %v159_v6 }
  0xb3   :  { %v213_v30 = vadd.f32 %v212_v19, %v209_v15  ;;  %v261_v31 = vadd.f32 %v260_v20, %v257_v16  ;;  %v311_v32 = vadd.f32 %v310_v21, %v307_v17  ;;  %v361_v33 = vadd.f32 %v360_v22, %v357_v18 }
  0xb9   :  { %v199_v29 = vpop.xlane.xlu1 %198 }
  0xba   :  { %v216_v34 = vmul.f32 %v215_v24, %v199_v29  ;;  %v264_v35 = vmul.f32 %v263_v25, %v199_v29  ;;  %v314_v36 = vmul.f32 %v313_v26, %v199_v29  ;;  %v364_v37 = vmul.f32 %v363_v28, %v199_v29 }
  0xbc   :  { %v217_v38 = vadd.f32 %v216_v34, %v213_v30  ;;  %v265_v39 = vadd.f32 %v264_v35, %v261_v31  ;;  %v315_v40 = vadd.f32 %v314_v36, %v311_v32  ;;  %v365_v41 = vadd.f32 %v364_v37, %v361_v33 }
  0xbe   :  { %v218_v42 = vmax.f32 %v217_v38, 0.0  ;;  %v266_v43 = vmax.f32 %v265_v39, 0.0  ;;  %v316_v44 = vmax.f32 %v315_v40, 0.0  ;;  %v366_v45 = vmax.f32 %v365_v41, 0.0 }
  0xc0   :  { %v420_v46 = vmul.f32 -1.442695, %v218_v42  ;;  %v426_v47 = vmul.f32 -1.442695, %v266_v43  ;;  %v432_v49 = vmul.f32 -1.442695, %v316_v44 }
  0xc1   :  { %v438_v50 = vmul.f32 -1.442695, %v366_v45 }
  0xc2   :  { %443 = vpow2.f32 %v420_v46 }
  0xc3   :  { %445 = vpow2.f32 %v426_v47 }
  0xc4   :  { %447 = vpow2.f32 %v432_v49 }
  0xc5   :  { %449 = vpow2.f32 %v438_v50 }
  0xc8   :  { %v444_v51 = vpop.eup %443 }
  0xc9   :  { %v446_v53 = vpop.eup %445  ;;  %v222_v54 = vadd.f32 1.0, %v444_v51 }
  0xca   :  { %v448_v55 = vpop.eup %447  ;;  %v270_v56 = vadd.f32 1.0, %v446_v53 }
  0xcb   :  { %v450_v57 = vpop.eup %449  ;;  %451 = vrcp.f32 %v222_v54  ;;  %v320_v58 = vadd.f32 1.0, %v448_v55  ;;  %v232_v63 = vand.u32 2147483647, %v222_v54  ;;  %v234_v3 = vand.u32 2147483648, %v222_v54 }
  0xcc   :  { %453 = vrcp.f32 %v270_v56  ;;  %v370_v59 = vadd.f32 1.0, %v450_v57  ;;  %v280_v4 = vand.u32 2147483647, %v270_v56  ;;  %v282_v8 = vand.u32 2147483648, %v270_v56 }
  0xcd   :  { %455 = vrcp.f32 %v320_v58  ;;  %vm228_vm1 = vweird.f32 %v222_v54  ;;  %vm276_vm2 = vweird.f32 %v270_v56  ;;  %vm648_vm3 = vcmp.eq.f32.partialorder %v232_v63, 8.507059e+37 }
  0xce   :  { %457 = vrcp.f32 %v370_v59  ;;  %v235_v14 = vor.u32 1.1754944e-38, %v234_v3  ;;  %vm652_vm4 = vcmp.eq.f32.partialorder %v280_v4, 8.507059e+37  ;;  %v283_v19 = vor.u32 1.1754944e-38, %v282_v8 }
  0xcf   :  { %vm326_vm7 = vweird.f32 %v320_v58  ;;  %v330_v26 = vand.u32 2147483647, %v320_v58  ;;  %v332_v28 = vand.u32 2147483648, %v320_v58  ;;  %vm376_vm9 = vweird.f32 %v370_v59 }
  0xd0   :  { %v380_v31 = vand.u32 2147483647, %v370_v59  ;;  %v382_v34 = vand.u32 2147483648, %v370_v59 }
  0xd1   :  { %v452_v62 = vpop.eup %451  ;;  %vm331_vm13 = vcmp.eq.f32.partialorder %v330_v26, 8.507059e+37  ;;  %v333_v42 = vor.u32 1.1754944e-38, %v332_v28 }
  0xd2   :  { %v454_v6 = vpop.eup %453  ;;  %v224_v7 = vmul.f32 %v452_v62, %v222_v54  ;;  %vm229_vm5 = vweird.f32 %v452_v62  ;;  %vm381_vm15 = vcmp.eq.f32.partialorder %v380_v31, 8.507059e+37  ;;  %v383_v45 = vor.u32 1.1754944e-38, %v382_v34 }
  0xd3   :  { %v272_v9 = vmul.f32 %v454_v6, %v270_v56  ;;  %v456_v12 = vpop.eup %455  ;;  %vm277_vm6 = vweird.f32 %v454_v6  ;;  %vm230_vm8 = vmor %vm228_vm1, %vm229_vm5 }
  0xd4   :  { %v225_v11 = vsub.f32 1.0, %v224_v7  ;;  %v458_v17 = vpop.eup %457  ;;  %v322_v20 = vmul.f32 %v456_v12, %v320_v58  ;;  %vm278_vm10 = vmor %vm276_vm2, %vm277_vm6  ;;  %vm327_vm11 = vweird.f32 %v456_v12 }
  0xd5   :  { %v273_v15 = vsub.f32 1.0, %v272_v9  ;;  %v372_v22 = vmul.f32 %v458_v17, %v370_v59  ;;  %vm377_vm12 = vweird.f32 %v458_v17  ;;  %vm328_vm14 = vmor %vm326_vm7, %vm327_vm11 }
  0xd6   :  { %v226_v18 = vmul.f32 %v452_v62, %v225_v11  ;;  %v323_v25 = vsub.f32 1.0, %v322_v20  ;;  %vm378_vm0 = vmor %vm376_vm9, %vm377_vm12 }
  0xd7   :  { %v274_v21 = vmul.f32 %v454_v6, %v273_v15  ;;  %v373_v30 = vsub.f32 1.0, %v372_v22 }
  0xd8   :  { %v227_v24 = vadd.f32 %v452_v62, %v226_v18  ;;  %v324_v33 = vmul.f32 %v456_v12, %v323_v25 }
  0xd9   :  { %v275_v29 = vadd.f32 %v454_v6, %v274_v21  ;;  %v374_v37 = vmul.f32 %v458_v17, %v373_v30 }
  0xda   :  { %v231_v32 = vsel %vm230_vm8, %v452_v62, %v227_v24  ;;  %v325_v40 = vadd.f32 %v456_v12, %v324_v33 }
  0xdb   :  { %v236_v35 = vsel %vm648_vm3, %v235_v14, %v231_v32  ;;  %v279_v36 = vsel %vm278_vm10, %v454_v6, %v275_v29  ;;  %v375_v43 = vadd.f32 %v458_v17, %v374_v37 }
  0xdc   :  { %v242_v38 = vperm.slane %v236_v35, %v241_v10  ;;  %v284_v39 = vsel %vm652_vm4, %v283_v19, %v279_v36  ;;  %v329_v44 = vsel %vm328_vm14, %v456_v12, %v325_v40 }
  0xdd   :  { %v292_v41 = vperm.slane %v284_v39, %v241_v10  ;;  %v334_v49 = vsel %vm331_vm13, %v333_v42, %v329_v44  ;;  %v379_v50 = vsel %vm378_vm0, %v458_v17, %v375_v43 }
  0xde   :  { %v244_v46 = vmul.f32 %v242_v38, %v550_v0  ;;  %v245_v47 = vmul.f32 %v242_v38, %v552_v1  ;;  %v342_v54 = vperm.slane %v334_v49, %v241_v10  ;;  %v384_v55 = vsel %vm381_vm15, %v383_v45, %v379_v50 }
  0xdf   :  { %v294_v51 = vmul.f32 %v292_v41, %v556_v2  ;;  %v295_v53 = vmul.f32 %v292_v41, %v558_v5  ;;  %v392_v56 = vperm.slane %v384_v55, %v241_v10 }
  0xe0   :  { %246 = vst [vmem:[#allocation7] sm:$0xff] %v244_v46  ;;  %v344_v57 = vmul.f32 %v342_v54, %v570_v23  ;;  %v345_v58 = vmul.f32 %v342_v54, %v572_v27 }
  0xe1   :  { %247 = vst [vmem:[#allocation7 + $0x8] sm:$0xff] %v245_v47  ;;  %v394_v0 = vmul.f32 %v392_v56, %v584_v48  ;;  %v395_v1 = vmul.f32 %v392_v56, %v586_v52 }
  0xe2   :  { %296 = vst [vmem:[#allocation7 + $0x10] sm:$0xff] %v294_v51 }
  0xe3   :  { %297 = vst [vmem:[#allocation7 + $0x18] sm:$0xff] %v295_v53 }
  0xe4   :  { %346 = vst [vmem:[#allocation7 + $0x20] sm:$0xff] %v344_v57 }
  0xe5   :  { %347 = vst [vmem:[#allocation7 + $0x28] sm:$0xff] %v345_v58 }
  0xe6   :  { %396 = vst [vmem:[#allocation7 + $0x30] sm:$0xff] %v394_v0 }
  0xe7   :  { %397 = vst [vmem:[#allocation7 + $0x38] sm:$0xff] %v395_v1 }
  0xe8   :  { %408 = dma.vmem_to_hbm [thread:$0]  %s404_s9, 1024, %s406_s12, [#allocation4]  }
  0xe9   :  { %523 = dma.done.wait [#allocation4], 1024  }
  0xea   :  { %524 = vsyncadd [#allocation4], 4294966272 }
  0xeb   :  { %413 = vsyncpa [#allocation3], 1 }
  0xec   :  { %414 = vsyncpa [#allocation4], 1 }
  0xed   :  { %415 = vsyncpa [#allocation5], 1 }

</bundles_post_ra>
